<compile_context>
chip_gen: v6e
topology: v6e:2x2x1
jax: 0.10.0
libtpu: 0.0.40
codegen_flags: <defaults>
</compile_context>

<pallas_src>
import jax
import jax.numpy as jnp
from jax.experimental import pallas as pl
from jax.experimental.pallas import tpu as pltpu


def _round_up(x, m):
    return (x + m - 1) // m * m


def fcbnrelu1dres_kernel(x_ref, w1_ref, w2_ref, sh_ref, o_ref):
    """One row-tile of the fused block.

    x_ref : (TM, Cp)  rows = (batch * position), channels on the lane dim
    w1_ref: (Cp, Cp)  conv1 weight^T with BN1 scale folded in
    w2_ref: (Cp, Cp)  conv2 weight^T with BN2 scale folded in
    sh_ref: (2, Cp)   row 0 = BN1 shift, row 1 = BN2 shift
    """
    x = x_ref[...]
    x_f32 = x.astype(jnp.float32)
    sh = sh_ref[...].astype(jnp.float32)

    # Conv1d #1 (k=1, no bias); BN1 scale already folded into the weight.
    h = jnp.dot(x.astype(w1_ref.dtype), w1_ref[...],
                preferred_element_type=jnp.float32)
    h = jnp.maximum(h + sh[0:1, :], 0.0)          # BN1 shift + ReLU

    # Conv1d #2 (k=1, no bias); BN2 scale already folded into the weight.
    y = jnp.dot(h.astype(w2_ref.dtype), w2_ref[...],
                preferred_element_type=jnp.float32)
    y = y + sh[1:2, :]                            # BN2 shift

    # Residual add + final ReLU.
    o_ref[...] = jnp.maximum(y + x_f32, 0.0).astype(o_ref.dtype)


def _choose_tile_rows(m_rows, c_pad, weight_bytes,
                      budget_bytes=40 * 1024 * 1024, max_tile=1024):
    """Pick the largest row tile (multiple of 8, <= max_tile) that fits a VMEM
    budget conservative enough for v7x (64 MiB physical)."""
    per_row = 2 * 2 * c_pad * 4          # x + out tiles, double-buffered, 4B upper bound
    avail = max(budget_bytes - weight_bytes, per_row * 8)
    tile = min(max_tile, max(8, (avail // per_row) // 8 * 8))
    tile = min(tile, _round_up(m_rows, 8))
    return int(max(tile, 8))


def fcbnrelu1dres(x, w1, bn1, w2, bn2, eps=1e-5, tile_rows=None, mxu_dtype=None):
    """x: (B, C, N) NCW input.  w*: (C_out, C_in).  bn*: (gamma, beta, mean, var).

    mxu_dtype: optionally cast matmul operands (e.g. jnp.bfloat16 on v6e/v7x);
    affine/ReLU/residual math stays in f32.
    """
    B, C, N = x.shape

    # Fold BN (inference) into per-channel scale / shift.
    def fold(bn):
        gamma, beta, mean, var = bn
        scale = gamma / jnp.sqrt(var + eps)
        shift = beta - mean * scale
        return scale, shift

    s1, sh1 = fold(bn1)
    s2, sh2 = fold(bn2)

    # Fold BN scale into the transposed conv weights (kernel only adds shifts).
    w1s = jnp.transpose(w1, (1, 0)) * s1[None, :]   # (C_in, C_out)
    w2s = jnp.transpose(w2, (1, 0)) * s2[None, :]

    # (B, C, N) -> (B, N, C) -> (B*N, C): channels on the lane (fast) dim.
    x2d = jnp.transpose(x, (0, 2, 1)).reshape(B * N, C)
    M = B * N

    # Lane-dense channel dim.
    Cp = _round_up(C, 128)
    w_elem_bytes = 2 if mxu_dtype == jnp.bfloat16 else 4
    weight_vmem = 2 * 2 * Cp * Cp * w_elem_bytes    # 2 weights, double-buffered

    if tile_rows is None:
        tile_rows = _choose_tile_rows(M, Cp, weight_vmem)
    tile_rows = max(8, _round_up(int(tile_rows), 8))
    Mp = _round_up(M, tile_rows)

    # Zero-pad rows (to the tile) and channels (to 128 multiple); padded
    # channels/rows compute zeros and are sliced off afterwards.
    x_p = jnp.pad(x2d, ((0, Mp - M), (0, Cp - C)))
    w1_p = jnp.pad(w1s, ((0, Cp - C), (0, Cp - C)))
    w2_p = jnp.pad(w2s, ((0, Cp - C), (0, Cp - C)))
    sh_p = jnp.pad(jnp.stack([sh1, sh2], axis=0), ((0, 0), (0, Cp - C)))

    if mxu_dtype is not None:
        w1_p = w1_p.astype(mxu_dtype)
        w2_p = w2_p.astype(mxu_dtype)

    grid = (Mp // tile_rows,)
    row_spec = pl.BlockSpec((tile_rows, Cp), lambda i: (i, 0))
    w_spec = pl.BlockSpec((Cp, Cp), lambda i: (0, 0))
    sh_spec = pl.BlockSpec((2, Cp), lambda i: (0, 0))

    x_bytes = x_p.dtype.itemsize
    vmem_est = (2 * tile_rows * Cp * x_bytes * 2      # x + out tiles, double-buffered
                + weight_vmem
                + 2 * 2 * Cp * 4
                + 2 * tile_rows * Cp * 4)             # f32 intermediates headroom
    vmem_limit = int(min(max(2 * vmem_est, 32 * 1024 * 1024), 64 * 1024 * 1024))

    cost = pl.CostEstimate(
        flops=2 * 2 * Mp * Cp * Cp,                   # two matmuls
        transcendentals=0,
        bytes_accessed=(2 * Mp * Cp * x_bytes         # x in + out
                        + 2 * Cp * Cp * w_elem_bytes  # two weights
                        + 2 * Cp * 4),                # shifts
    )

    out_p = pl.pallas_call(
        fcbnrelu1dres_kernel,
        out_shape=jax.ShapeDtypeStruct((Mp, Cp), x.dtype),
        grid_spec=pltpu.PrefetchScalarGridSpec(
            num_scalar_prefetch=0,
            grid=grid,
            in_specs=[row_spec, w_spec, w_spec, sh_spec],
            out_specs=row_spec,
        ),
        compiler_params=pltpu.CompilerParams(
            dimension_semantics=("parallel",),
            vmem_limit_bytes=vmem_limit),
        cost_estimate=cost,
    )(x_p, w1_p, w2_p, sh_p)

    out2d = out_p[:M, :C]
    # (B*N, C) -> (B, N, C) -> (B, C, N)
    return jnp.transpose(out2d.reshape(B, N, C), (0, 2, 1))


def reference(x, w1, bn1, w2, bn2, eps=1e-5):
    def bn_apply(y, bn):
        gamma, beta, mean, var = bn
        scale = (gamma / jnp.sqrt(var + eps))[None, :, None]
        shift = (beta - mean * gamma / jnp.sqrt(var + eps))[None, :, None]
        return y * scale + shift

    h = jnp.einsum('oi,bin->bon', w1, x)
    h = jnp.maximum(bn_apply(h, bn1), 0.0)
    y = jnp.einsum('oi,bin->bon', w2, h)
    y = bn_apply(y, bn2)
    return jnp.maximum(y + x, 0.0)


if __name__ == "__main__":
    key = jax.random.PRNGKey(0)
    B, C, N = 2, 32, 16  # small shapes consistent with Conv1d/BatchNorm1d on (B, C, N)

    k = jax.random.split(key, 7)
    x = jax.random.normal(k[0], (B, C, N), dtype=jnp.float32)
    w1 = jax.random.normal(k[1], (C, C), dtype=jnp.float32) * 0.1
    w2 = jax.random.normal(k[2], (C, C), dtype=jnp.float32) * 0.1
    bn1 = (jnp.ones((C,), jnp.float32),                        # gamma
           jnp.zeros((C,), jnp.float32),                       # beta
           jax.random.normal(k[3], (C,), jnp.float32) * 0.05,  # running_mean
           jnp.ones((C,), jnp.float32) +
           jax.random.uniform(k[4], (C,), jnp.float32) * 0.1)  # running_var
    bn2 = (jnp.ones((C,), jnp.float32),
           jnp.zeros((C,), jnp.float32),
           jax.random.normal(k[5], (C,), jnp.float32) * 0.05,
           jnp.ones((C,), jnp.float32) +
           jax.random.uniform(k[6], (C,), jnp.float32) * 0.1)

    out = fcbnrelu1dres(x, w1, bn1, w2, bn2)
    out = jax.block_until_ready(out)

    ref = reference(x, w1, bn1, w2, bn2)
    assert out.shape == (B, C, N)
    assert jnp.allclose(out, ref, atol=1e-4, rtol=1e-4), "mismatch vs reference"

    print("KERNEL_OK")
</pallas_src>

<mosaic_0001>
module attributes {stable_mosaic.version = 11 : i64} {
  func.func @fcbnrelu1dres_kernel(%arg0: i32, %arg1: memref<32x128xf32, #tpu.memory_space<vmem>>, %arg2: memref<128x128xf32, #tpu.memory_space<vmem>>, %arg3: memref<128x128xf32, #tpu.memory_space<vmem>>, %arg4: memref<2x128xf32, #tpu.memory_space<vmem>>, %arg5: memref<32x128xf32, #tpu.memory_space<vmem>>) attributes {dimension_semantics = [#tpu.dimension_semantics<parallel>], iteration_bounds = array<i64: 1>, scalar_prefetch = 0 : i64, scratch_operands = 0 : i64, tpu.core_type = #tpu.core_type<tc>, window_params = [{transform_indices = @transform_0, window_bounds = array<i64: 32, 128>}, {pipeline_mode = #tpu.pipeline_mode<synchronous>, transform_indices = @transform_1, window_bounds = array<i64: 128, 128>}, {pipeline_mode = #tpu.pipeline_mode<synchronous>, transform_indices = @transform_2, window_bounds = array<i64: 128, 128>}, {pipeline_mode = #tpu.pipeline_mode<synchronous>, transform_indices = @transform_3, window_bounds = array<i64: 2, 128>}, {transform_indices = @transform_4, window_bounds = array<i64: 32, 128>}]} {
    %c0 = arith.constant 0 : index
    %c0_0 = arith.constant 0 : index
    %0 = vector.load %arg1[%c0, %c0_0] : memref<32x128xf32, #tpu.memory_space<vmem>>, vector<32x128xf32>
    %c0_1 = arith.constant 0 : index
    %c0_2 = arith.constant 0 : index
    %1 = vector.load %arg4[%c0_1, %c0_2] : memref<2x128xf32, #tpu.memory_space<vmem>>, vector<2x128xf32>
    %c0_3 = arith.constant 0 : index
    %c0_4 = arith.constant 0 : index
    %2 = vector.load %arg2[%c0_3, %c0_4] : memref<128x128xf32, #tpu.memory_space<vmem>>, vector<128x128xf32>
    %cst = arith.constant dense<0.000000e+00> : vector<32x128xf32>
    %3 = tpu.matmul %0, %2, %cst {dimension_numbers = #tpu.dot_dimension_numbers<[1], [0], [0], [1], [0, 0, 1, 1], [], []>} : vector<32x128xf32>, vector<128x128xf32>, vector<32x128xf32> -> vector<32x128xf32>
    %4 = vector.extract_strided_slice %1 {offsets = [0, 0], sizes = [1, 128], strides = [1, 1]} : vector<2x128xf32> to vector<1x128xf32>
    %5 = vector.broadcast %4 : vector<1x128xf32> to vector<32x128xf32>
    %6 = arith.addf %3, %5 : vector<32x128xf32>
    %cst_5 = arith.constant 0.000000e+00 : f32
    %7 = vector.broadcast %cst_5 : f32 to vector<32x128xf32>
    %8 = arith.maximumf %6, %7 : vector<32x128xf32>
    %c0_6 = arith.constant 0 : index
    %c0_7 = arith.constant 0 : index
    %9 = vector.load %arg3[%c0_6, %c0_7] : memref<128x128xf32, #tpu.memory_space<vmem>>, vector<128x128xf32>
    %cst_8 = arith.constant dense<0.000000e+00> : vector<32x128xf32>
    %10 = tpu.matmul %8, %9, %cst_8 {dimension_numbers = #tpu.dot_dimension_numbers<[1], [0], [0], [1], [0, 0, 1, 1], [], []>} : vector<32x128xf32>, vector<128x128xf32>, vector<32x128xf32> -> vector<32x128xf32>
    %11 = vector.extract_strided_slice %1 {offsets = [1, 0], sizes = [1, 128], strides = [1, 1]} : vector<2x128xf32> to vector<1x128xf32>
    %12 = vector.broadcast %11 : vector<1x128xf32> to vector<32x128xf32>
    %13 = arith.addf %10, %12 : vector<32x128xf32>
    %14 = arith.addf %13, %0 : vector<32x128xf32>
    %cst_9 = arith.constant 0.000000e+00 : f32
    %15 = vector.broadcast %cst_9 : f32 to vector<32x128xf32>
    %16 = arith.maximumf %14, %15 : vector<32x128xf32>
    %c0_10 = arith.constant 0 : index
    %c0_11 = arith.constant 0 : index
    %17 = vector.load %arg5[%c0_10, %c0_11] : memref<32x128xf32, #tpu.memory_space<vmem>>, vector<32x128xf32>
    tpu.vector_store %arg5[%c0_10, %c0_11], %16 {strides = array<i32>} : memref<32x128xf32, #tpu.memory_space<vmem>>, vector<32x128xf32>,
    return
  }
  func.func @transform_0(%arg0: i32) -> (i32, i32) {
    %c0_i32 = arith.constant 0 : i32
    %c0_i32_0 = arith.constant 0 : i32
    return %arg0, %c0_i32 : i32, i32
  }
  func.func @transform_1(%arg0: i32) -> (i32, i32) {
    %c0_i32 = arith.constant 0 : i32
    %c0_i32_0 = arith.constant 0 : i32
    %c0_i32_1 = arith.constant 0 : i32
    return %c0_i32, %c0_i32_0 : i32, i32
  }
  func.func @transform_2(%arg0: i32) -> (i32, i32) {
    %c0_i32 = arith.constant 0 : i32
    %c0_i32_0 = arith.constant 0 : i32
    %c0_i32_1 = arith.constant 0 : i32
    return %c0_i32, %c0_i32_0 : i32, i32
  }
  func.func @transform_3(%arg0: i32) -> (i32, i32) {
    %c0_i32 = arith.constant 0 : i32
    %c0_i32_0 = arith.constant 0 : i32
    %c0_i32_1 = arith.constant 0 : i32
    return %c0_i32, %c0_i32_0 : i32, i32
  }
  func.func @transform_4(%arg0: i32) -> (i32, i32) {
    %c0_i32 = arith.constant 0 : i32
    %c0_i32_0 = arith.constant 0 : i32
    return %arg0, %c0_i32 : i32, i32
  }
}

</mosaic_0001>

<bundles_post_ra>
// kernel: tpu_custom_call.1
= control target key start
LH: loop header
LB: loop body
LE: loop exit
PB: predicated region body
PF: predicated region fallthrough
CT: control target
= control target key end

     0   :  { %9 = vsyncpa [#allocation3], 0  ;;  %s578_s0 = inlined_call_operand.hbm [shape: f32[32,128], index: 0, kind: input, shape index: {}]   ;;  %s579_s1 = inlined_call_operand.hbm [shape: f32[128,128], index: 1, kind: input, shape index: {}]   ;;  %s580_s2 = inlined_call_operand.hbm [shape: f32[128,128], index: 2, kind: input, shape index: {}]   ;;  %s581_s3 = inlined_call_operand.vmem [shape: f32[2,128], index: 3, kind: input, shape index: {}]   ;;  %s582_s4 = inlined_call_operand.hbm [shape: f32[32,128], index: 4, kind: output, shape index: {}]  }
   0x1   :  { %10 = vsyncpa [#allocation6], 0 }
   0x2   :  { %11 = vsyncpa [#allocation4], 0  ;;  %s516_s15 = smov [#allocation5]   ;;  %s517_s17 = smov [#allocation2]  }
   0x3   :  { %s29_s16 = sshll.u32 %s516_s15, 4  ;;  %s17_s18 = sshll.u32 %s517_s17, 4  ;;  %s30_s16 = int_to_ptr.vmem [resolvable:$true] %s29_s16  ;;  %s18_s18 = int_to_ptr.vmem [resolvable:$true] %s17_s18 }
   0x4   :  { %s438_s19 = scalar_lea.vmem %s30_s16, 2048  ;;  %p443_p1 = scmp.lt.s32.totalorder %s30_s16, %s30_s16 }
   0x5   :  { %p439_p0 = scmp.ne.s32.totalorder %s30_s16, %s438_s19  ;;  %p444_p2 = scmp.lt.s32.totalorder %s438_s19, %s438_s19 }
   0x7   :  { %p445_p3 = por %p444_p2, %p443_p1 }
   0x9   :  { %p446_p4 = pnand %p445_p3, %p439_p0 }
   0xb   :  { %449 = shalt.err (!%p446_p4)
}
   0xc   :  { %s518_s20 = smov 128   ;;  %s519_s21 = smov 8  }
   0xd   :  { %35 = dma.hbm_to_vmem [thread:$0]  %s579_s1, 2048, %s30_s16, [#allocation6], %s518_s20, %s518_s20, %s519_s21  }
   0xe   :  { %s458_s24 = scalar_lea.vmem %s18_s18, 512  ;;  %p463_p6 = scmp.lt.s32.totalorder %s18_s18, %s18_s18 }
   0xf   :  { %p459_p5 = scmp.ne.s32.totalorder %s18_s18, %s458_s24  ;;  %p464_p7 = scmp.lt.s32.totalorder %s458_s24, %s458_s24 }
  0x11   :  { %p465_p8 = por %p464_p7, %p463_p6 }
  0x13   :  { %p466_p9 = pnand %p465_p8, %p459_p5 }
  0x15   :  { %469 = shalt.err (!%p466_p9)
}
  0x16   :  { %23 = dma.hbm_to_vmem [thread:$0]  %s578_s0, 512, %s18_s18, [#allocation3], %s518_s20, %s518_s20, %s519_s21  }
  0x17   :  { %s520_s27 = smov [#allocation7]  }
  0x18   :  { %s41_s28 = sshll.u32 %s520_s27, 4  ;;  %s42_s28 = int_to_ptr.vmem [resolvable:$true] %s41_s28 }
  0x19   :  { %s478_s29 = scalar_lea.vmem %s42_s28, 2048  ;;  %p483_p11 = scmp.lt.s32.totalorder %s42_s28, %s42_s28 }
  0x1a   :  { %p479_p10 = scmp.ne.s32.totalorder %s42_s28, %s478_s29  ;;  %p484_p12 = scmp.lt.s32.totalorder %s478_s29, %s478_s29 }
  0x1c   :  { %p485_p13 = por %p484_p12, %p483_p11 }
  0x1e   :  { %p486_p0 = pnand %p485_p13, %p479_p10 }
  0x20   :  { %489 = shalt.err (!%p486_p0)
}
  0x21   :  { %47 = dma.hbm_to_vmem [thread:$0]  %s580_s2, 2048, %s42_s28, [#allocation6], %s518_s20, %s518_s20, %s519_s21  }
  0x22   :  { %510 = dma.done.wait [#allocation3], 512  }
  0x23   :  { %511 = vsyncadd [#allocation3], 4294966784 }
  0x24   :  { %512 = dma.done.wait [#allocation6], 4096  }
  0x25   :  { %513 = vsyncadd [#allocation6], 4294963200  ;;  %v79_v0 = vld [vmem:[#allocation5 + $0x78] sm:$0xff]  ;;  %v78_v1 = vld [vmem:[#allocation5 + $0x70] sm:$0xff]  ;;  %v80_v36 = vlaneseq }
  0x26   :  { %348 = vmatprep.subr.mxu0 %v79_v0  ;;  %v77_v2 = vld [vmem:[#allocation5 + $0x68] sm:$0xff]  ;;  %v76_v3 = vld [vmem:[#allocation5 + $0x60] sm:$0xff]  ;;  %v75_v5 = vld [vmem:[#allocation5 + $0x58] sm:$0xff] }
  0x27   :  { %349 = vmatpush3.msra.mxu0 %v79_v0  ;;  %v565_v4 = vld [vmem:[#allocation2] sm:$0xff]  ;;  %v188_v6 = vld [vmem:[#allocation7 + $0x78] sm:$0xff]  ;;  %v187_v7 = vld [vmem:[#allocation7 + $0x70] sm:$0xff]  ;;  %v81_v37 = vshrl.u32 %v80_v36, 7 }
  0x28   :  { %350 = vmatprep.subr.mxu0 %v78_v1  ;;  %380 = vmatprep.mubr.f32.mxu0 %v565_v4  ;;  %v74_v8 = vld [vmem:[#allocation5 + $0x50] sm:$0xff]  ;;  %v186_v9 = vld [vmem:[#allocation7 + $0x68] sm:$0xff]  ;;  %v185_v11 = vld [vmem:[#allocation7 + $0x60] sm:$0xff] }
  0x29   :  { %351 = vmatpush3.msra.mxu0 %v78_v1  ;;  %386 = vmatprep.subr.mxu1 %v188_v6  ;;  %v73_v10 = vld [vmem:[#allocation5 + $0x48] sm:$0xff]  ;;  %v72_v12 = vld [vmem:[#allocation5 + $0x40] sm:$0xff]  ;;  %v184_v13 = vld [vmem:[#allocation7 + $0x58] sm:$0xff]  ;;  %v82_v38 = vsub.s32 0, %v81_v37  ;;  %v191_v53 = vsub.s32 1, %v81_v37 }
  0x2a   :  { %352 = vmatprep.subr.mxu0 %v77_v2  ;;  %387 = vmatpush3.msra.mxu1 %v188_v6  ;;  %v71_v14 = vld [vmem:[#allocation5 + $0x38] sm:$0xff]  ;;  %v183_v15 = vld [vmem:[#allocation7 + $0x50] sm:$0xff]  ;;  %v182_v17 = vld [vmem:[#allocation7 + $0x48] sm:$0xff] }
  0x2b   :  { %353 = vmatpush3.msra.mxu0 %v77_v2  ;;  %388 = vmatprep.subr.mxu1 %v187_v7  ;;  %v70_v16 = vld [vmem:[#allocation5 + $0x30] sm:$0xff]  ;;  %v69_v18 = vld [vmem:[#allocation5 + $0x28] sm:$0xff]  ;;  %v181_v19 = vld [vmem:[#allocation7 + $0x40] sm:$0xff] }
  0x2c   :  { %354 = vmatprep.subr.mxu0 %v76_v3  ;;  %389 = vmatpush3.msra.mxu1 %v187_v7  ;;  %v68_v20 = vld [vmem:[#allocation5 + $0x20] sm:$0xff]  ;;  %v180_v21 = vld [vmem:[#allocation7 + $0x38] sm:$0xff]  ;;  %v179_v23 = vld [vmem:[#allocation7 + $0x30] sm:$0xff] }
  0x2d   :  { %355 = vmatpush3.msra.mxu0 %v76_v3  ;;  %390 = vmatprep.subr.mxu1 %v186_v9  ;;  %v67_v22 = vld [vmem:[#allocation5 + $0x18] sm:$0xff]  ;;  %v66_v24 = vld [vmem:[#allocation5 + $0x10] sm:$0xff]  ;;  %v178_v25 = vld [vmem:[#allocation7 + $0x28] sm:$0xff] }
  0x2e   :  { %356 = vmatprep.subr.mxu0 %v75_v5  ;;  %391 = vmatpush3.msra.mxu1 %v186_v9  ;;  %v65_v26 = vld [vmem:[#allocation5 + $0x8] sm:$0xff]  ;;  %v177_v27 = vld [vmem:[#allocation7 + $0x20] sm:$0xff]  ;;  %v61_v30 = vld [vmem:[#allocation2 + $0x10] sm:$0xff] }
  0x2f   :  { %357 = vmatpush3.msra.mxu0 %v75_v5  ;;  %392 = vmatprep.subr.mxu1 %v185_v11  ;;  %v64_v28 = vld [vmem:[#allocation5] sm:$0xff]  ;;  %v60_v29 = vld [vmem:[#allocation2 + $0x8] sm:$0xff]  ;;  %v62_v31 = vld [vmem:[#allocation2 + $0x18] sm:$0xff] }
  0x30   :  { %358 = vmatprep.subr.mxu0 %v74_v8  ;;  %393 = vmatpush3.msra.mxu1 %v185_v11  ;;  %v176_v32 = vld [vmem:[#allocation7 + $0x18] sm:$0xff]  ;;  %v175_v33 = vld [vmem:[#allocation7 + $0x10] sm:$0xff]  ;;  %v174_v34 = vld [vmem:[#allocation7 + $0x8] sm:$0xff] }
  0x31   :  { %359 = vmatpush3.msra.mxu0 %v74_v8  ;;  %394 = vmatprep.subr.mxu1 %v184_v13  ;;  %v173_v35 = vld [vmem:[#allocation7] sm:$0xff] }
  0x32   :  { %360 = vmatprep.subr.mxu0 %v73_v10  ;;  %395 = vmatpush3.msra.mxu1 %v184_v13  ;;  %v63_v39 = vld [vmem:[%s581_s3] sm:$0x3]  ;;  %s521_s3 = smov [#allocation8]  }
  0x33   :  { %361 = vmatpush3.msra.mxu0 %v73_v10  ;;  %396 = vmatprep.subr.mxu1 %v183_v15  ;;  %v83_v40 = vrot.slane %v63_v39, %v82_v38  ;;  %v192_v54 = vrot.slane %v63_v39, %v191_v53  ;;  %s295_s5 = sshll.u32 %s521_s3, 4  ;;  %s296_s5 = int_to_ptr.vmem [resolvable:$true] %s295_s5 }
  0x34   :  { %362 = vmatprep.subr.mxu0 %v72_v12  ;;  %397 = vmatpush3.msra.mxu1 %v183_v15  ;;  %s490_s6 = scalar_lea.vmem %s296_s5, 512  ;;  %p495_p2 = scmp.lt.s32.totalorder %s296_s5, %s296_s5 }
  0x35   :  { %363 = vmatpush3.msra.mxu0 %v72_v12  ;;  %398 = vmatprep.subr.mxu1 %v182_v17  ;;  %p491_p1 = scmp.ne.s32.totalorder %s296_s5, %s490_s6  ;;  %p496_p3 = scmp.lt.s32.totalorder %s490_s6, %s490_s6 }
  0x36   :  { %364 = vmatprep.subr.mxu0 %v71_v14  ;;  %399 = vmatpush3.msra.mxu1 %v182_v17 }
  0x37   :  { %365 = vmatpush3.msra.mxu0 %v71_v14  ;;  %400 = vmatprep.subr.mxu1 %v181_v19  ;;  %p497_p4 = por %p496_p3, %p495_p2 }
  0x38   :  { %366 = vmatprep.subr.mxu0 %v70_v16  ;;  %401 = vmatpush3.msra.mxu1 %v181_v19 }
  0x39   :  { %367 = vmatpush3.msra.mxu0 %v70_v16  ;;  %402 = vmatprep.subr.mxu1 %v180_v21  ;;  %p498_p5 = pnand %p497_p4, %p491_p1 }
  0x3a   :  { %368 = vmatprep.subr.mxu0 %v69_v18  ;;  %403 = vmatpush3.msra.mxu1 %v180_v21 }
  0x3b   :  { %369 = vmatpush3.msra.mxu0 %v69_v18  ;;  %404 = vmatprep.subr.mxu1 %v179_v23 }
  0x3c   :  { %370 = vmatprep.subr.mxu0 %v68_v20  ;;  %405 = vmatpush3.msra.mxu1 %v179_v23 }
  0x3d   :  { %371 = vmatpush3.msra.mxu0 %v68_v20  ;;  %406 = vmatprep.subr.mxu1 %v178_v25 }
  0x3e   :  { %372 = vmatprep.subr.mxu0 %v67_v22  ;;  %407 = vmatpush3.msra.mxu1 %v178_v25 }
  0x3f   :  { %373 = vmatpush3.msra.mxu0 %v67_v22  ;;  %408 = vmatprep.subr.mxu1 %v177_v27 }
  0x40   :  { %374 = vmatprep.subr.mxu0 %v66_v24  ;;  %409 = vmatpush3.msra.mxu1 %v177_v27 }
  0x41   :  { %375 = vmatpush3.msra.mxu0 %v66_v24  ;;  %410 = vmatprep.subr.mxu1 %v176_v32 }
  0x42   :  { %376 = vmatprep.subr.mxu0 %v65_v26  ;;  %411 = vmatpush3.msra.mxu1 %v176_v32 }
  0x43   :  { %377 = vmatpush3.msra.mxu0 %v65_v26  ;;  %412 = vmatprep.subr.mxu1 %v175_v33 }
  0x44   :  { %378 = vmatprep.subr.mxu0 %v64_v28  ;;  %413 = vmatpush3.msra.mxu1 %v175_v33 }
  0x45   :  { %379 = vmatpush3.msra.mxu0 %v64_v28  ;;  %414 = vmatprep.subr.mxu1 %v174_v34 }
  0x46   :  { %381 = vmatmul.mubr.f32.vlgmr.msra.gmra.mxu0 %v60_v29  ;;  %415 = vmatpush3.msra.mxu1 %v174_v34 }
  0x47   :  { %383 = vmatprep.mubr.f32.mxu0 %v61_v30  ;;  %416 = vmatprep.subr.mxu1 %v173_v35 }
  0x48   :  { %417 = vmatpush3.msra.mxu1 %v173_v35 }
  0x4a   :  { %384 = vmatmul.mubr.f32.gmra.mxu0 %v62_v31 }
 0x106   :  { %v382_v41 = vpop.f32.mrf.mxu0 }
 0x107   :  { %v156_v42 = vadd.f32 %v382_v41, %v83_v40 }
 0x108   :  { %v150_v43 = vpop.f32.mrf.mxu0 }
 0x109   :  { %v151_v44 = vadd.f32 %v150_v43, %v83_v40  ;;  %v170_v47 = vmax.f32 %v156_v42, 0.0 }
 0x10a   :  { %v385_v45 = vpop.f32.mrf.mxu0 }
 0x10b   :  { %v169_v46 = vmax.f32 %v151_v44, 0.0  ;;  %v166_v48 = vadd.f32 %v385_v45, %v83_v40 }
 0x10c   :  { %v160_v49 = vpop.f32.mrf.mxu0 }
 0x10d   :  { %v161_v50 = vadd.f32 %v160_v49, %v83_v40  ;;  %418 = vmatprep.mubr.f32.mxu1 %v169_v46  ;;  %v172_v52 = vmax.f32 %v166_v48, 0.0 }
 0x10e   :  { %419 = vmatmul.mubr.f32.vlgmr.msra.gmra.mxu1 %v170_v47 }
 0x10f   :  { %v171_v51 = vmax.f32 %v161_v50, 0.0 }
 0x111   :  { %421 = vmatprep.mubr.f32.mxu1 %v171_v51 }
 0x112   :  { %422 = vmatmul.mubr.f32.gmra.mxu1 %v172_v52 }
 0x1ce   :  { %v420_v55 = vpop.f32.mrf.mxu1 }
 0x1cf   :  { %v265_v56 = vadd.f32 %v420_v55, %v192_v54 }
 0x1d0   :  { %v259_v57 = vpop.f32.mrf.mxu1 }
 0x1d1   :  { %v279_v58 = vadd.f32 %v265_v56, %v60_v29  ;;  %v260_v59 = vadd.f32 %v259_v57, %v192_v54 }
 0x1d2   :  { %v423_v60 = vpop.f32.mrf.mxu1 }
 0x1d3   :  { %v283_v61 = vmax.f32 %v279_v58, 0.0  ;;  %v278_v62 = vadd.f32 %v260_v59, %v565_v4  ;;  %v275_v63 = vadd.f32 %v423_v60, %v192_v54 }
 0x1d4   :  { %v269_v0 = vpop.f32.mrf.mxu1 }
 0x1d5   :  { %287 = vst [vmem:[#allocation8 + $0x8] sm:$0xff] %v283_v61  ;;  %v282_v1 = vmax.f32 %v278_v62, 0.0  ;;  %v281_v2 = vadd.f32 %v275_v63, %v62_v31  ;;  %v270_v3 = vadd.f32 %v269_v0, %v192_v54 }
 0x1d7   :  { %286 = vst [vmem:[#allocation8] sm:$0xff] %v282_v1  ;;  %v285_v5 = vmax.f32 %v281_v2, 0.0  ;;  %v280_v6 = vadd.f32 %v270_v3, %v61_v30 }
 0x1d9   :  { %289 = vst [vmem:[#allocation8 + $0x18] sm:$0xff] %v285_v5  ;;  %v284_v7 = vmax.f32 %v280_v6, 0.0 }
 0x1db   :  { %288 = vst [vmem:[#allocation8 + $0x10] sm:$0xff] %v284_v7 }
 0x1dc   :  { %501 = shalt.err (!%p498_p5)
}
 0x1dd   :  { %301 = dma.vmem_to_hbm [thread:$0]  %s296_s5, 512, %s582_s4, [#allocation4], %s518_s20, %s518_s20, %s519_s21  }
 0x1de   :  { %514 = dma.done.wait [#allocation4], 512  }
 0x1df   :  { %515 = vsyncadd [#allocation4], 4294966784 }
 0x1e0   :  { %305 = vsyncpa [#allocation3], 1 }
 0x1e1   :  { %306 = vsyncpa [#allocation6], 1 }
 0x1e2   :  { %307 = vsyncpa [#allocation4], 1 }

</bundles_post_ra>
